<compile_context>
chip_gen: v7x
topology: tpu7x:2x2x1
jax: 0.10.0
libtpu: 0.0.40
codegen_flags: <defaults>
</compile_context>

<pallas_src>
import jax
import jax.numpy as jnp
from jax.experimental import pallas as pl
from jax.experimental.pallas import tpu as pltpu


def _round_up(x, m):
    return (x + m - 1) // m * m


# Resident constant inputs larger than this are single-buffered (v7x VMEM is
# only 64 MiB); below it we keep the default (cheap, proven-clean) pipelining.
_SINGLE_BUFFER_CONST_BYTES = 4 * 1024 * 1024


def _embedding_kernel(x_ref, at_ref, asq_ref, b_ref, o_ref):
    # x_ref  : (TB, D_in)       batch tile of inputs
    # at_ref : (D_in, D_out)    anchors, pre-transposed (resident across grid)
    # asq_ref: (1, D_out)       precomputed ||a||^2 per anchor (resident)
    # b_ref  : (1, D_out)       biases (resident)
    # o_ref  : (TB, D_out)      output tile
    x = x_ref[...]                                         # f32
    x_sq = jnp.sum(x * x, axis=-1, keepdims=True)          # (TB, 1)

    # Cross term on the MXU; anchors already (D_in, D_out) -> no in-kernel
    # transpose. HIGHEST precision keeps the cancellation-prone identity tight.
    cross = jnp.dot(x, at_ref[...],
                    preferred_element_type=jnp.float32,
                    precision=jax.lax.Precision.HIGHEST)

    d2 = x_sq + asq_ref[...] - 2.0 * cross
    d2 = jnp.maximum(d2, 0.0)                 # guard tiny negatives from cancellation
    dist = jnp.sqrt(d2)                       # torch.norm(..., 2, 2)

    o_ref[...] = jnp.tanh(dist - b_ref[...])  # AnchorNet forward + nn.Tanh


def prepare_embedding_params(anchors, biases):
    """One-time (training-constant) weight prep; cache the result next to the
    weights instead of recomputing per forward call."""
    af = anchors.astype(jnp.float32)                       # (D_out, D_in)
    anchors_t = af.T                                       # (D_in, D_out)
    a_sq = jnp.sum(af * af, axis=-1).reshape(1, -1)        # (1, D_out)
    b_row = biases.astype(jnp.float32).reshape(1, -1)      # (1, D_out)
    return anchors_t, a_sq, b_row


def embedding_net_forward(x, prepared_params, *, block_b=2048):
    """x: (B, INPUT_D); prepared_params = prepare_embedding_params(anchors, biases)."""
    anchors_t, a_sq, b_row = prepared_params
    B, D_in = x.shape
    D_out = anchors_t.shape[1]

    xf = x.astype(jnp.float32)

    # Batch tile: big (amortize ~0.35us/step), multiple of 8 sublanes, and
    # capped so the grid has >= 2 steps when B allows it (v7x megacore split).
    TB = min(block_b, max(8, _round_up(pl.cdiv(B, 2), 8)))
    grid = (pl.cdiv(B, TB),)

    # Resident weight specs; single-buffer them only if they are big enough to
    # matter for VMEM (irrelevant at small anchor counts).
    const_bytes = anchors_t.size * anchors_t.dtype.itemsize
    if const_bytes > _SINGLE_BUFFER_CONST_BYTES:
        def const_spec(shape):
            return pl.BlockSpec(shape, lambda i: (0, 0),
                                pipeline_mode=pl.Buffered(1))
    else:
        def const_spec(shape):
            return pl.BlockSpec(shape, lambda i: (0, 0))

    out = pl.pallas_call(
        _embedding_kernel,
        out_shape=jax.ShapeDtypeStruct((B, D_out), jnp.float32),
        grid_spec=pltpu.PrefetchScalarGridSpec(
            num_scalar_prefetch=0,
            grid=grid,
            in_specs=[
                pl.BlockSpec((TB, D_in), lambda i: (i, 0)),   # x tile (unpadded)
                const_spec((D_in, D_out)),                    # anchors^T (resident)
                const_spec((1, D_out)),                       # ||a||^2   (resident)
                const_spec((1, D_out)),                       # biases    (resident)
            ],
            out_specs=pl.BlockSpec((TB, D_out), lambda i: (i, 0)),  # unpadded out
        ),
        compiler_params=pltpu.CompilerParams(
            dimension_semantics=("parallel",),       # megacore-shardable batch axis
            vmem_limit_bytes=32 * 1024 * 1024,       # safe on v7x's 64 MiB VMEM
        ),
    )(xf, anchors_t, a_sq, b_row)

    return out


def embedding_net_reference(x, anchors, biases):
    """Pure-JAX reference matching the PyTorch direct (x - a) formulation."""
    diff = x[:, None, :] - anchors[None, :, :]          # (B, D_out, D_in)
    dist = jnp.sqrt(jnp.sum(diff * diff, axis=-1))      # (B, D_out)
    return jnp.tanh(dist - biases[None, :])


def init_anchor_net_params(key, train_data, input_d, output_d):
    """Mirror AnchorNet.__init__ (non-test path): anchors ~ randn, biases =
    mean over the training batch of the anchor distances."""
    anchors = jax.random.normal(key, (output_d, input_d), dtype=jnp.float32)
    # TODO(synk): for large training sets, chunk this (N, D_out, D_in) broadcast.
    diff = train_data[:, None, :] - anchors[None, :, :]
    dists = jnp.sqrt(jnp.sum(diff * diff, axis=-1))     # (N, D_out)
    biases = dists.mean(axis=0)                         # (D_out,)
    return anchors, biases


if __name__ == "__main__":
    INPUT_D = 32
    OUTPUT_D = 16
    BATCH = 8
    N_TRAIN = 8

    key = jax.random.PRNGKey(0)
    k_anchor, k_train, k_x = jax.random.split(key, 3)

    train_data = jax.random.normal(k_train, (N_TRAIN, INPUT_D), dtype=jnp.float32)
    anchors, biases = init_anchor_net_params(k_anchor, train_data, INPUT_D, OUTPUT_D)

    # One-time weight prep, cached next to the parameters.
    prepared = prepare_embedding_params(anchors, biases)
    prepared = jax.block_until_ready(prepared)

    x = jax.random.normal(k_x, (BATCH, INPUT_D), dtype=jnp.float32)

    out = embedding_net_forward(x, prepared)
    jax.block_until_ready(out)

    assert out.shape == (BATCH, OUTPUT_D)
    assert out.dtype == jnp.float32
    assert bool(jnp.all(jnp.isfinite(out)))

    ref = embedding_net_reference(x, anchors, biases)
    assert bool(jnp.allclose(out, ref, rtol=1e-3, atol=1e-3))

    print("KERNEL_OK")
</pallas_src>

<mosaic_0001>
module attributes {stable_mosaic.version = 11 : i64} {
  func.func @_embedding_kernel(%arg0: i32, %arg1: memref<8x32xf32, #tpu.memory_space<vmem>>, %arg2: memref<32x16xf32, #tpu.memory_space<vmem>>, %arg3: memref<1x16xf32, #tpu.memory_space<vmem>>, %arg4: memref<1x16xf32, #tpu.memory_space<vmem>>, %arg5: memref<8x16xf32, #tpu.memory_space<vmem>>) attributes {dimension_semantics = [#tpu.dimension_semantics<parallel>], iteration_bounds = array<i64: 1>, scalar_prefetch = 0 : i64, scratch_operands = 0 : i64, tpu.core_type = #tpu.core_type<tc>, window_params = [{transform_indices = @transform_0, window_bounds = array<i64: 8, 32>}, {pipeline_mode = #tpu.pipeline_mode<synchronous>, transform_indices = @transform_1, window_bounds = array<i64: 32, 16>}, {pipeline_mode = #tpu.pipeline_mode<synchronous>, transform_indices = @transform_2, window_bounds = array<i64: 1, 16>}, {pipeline_mode = #tpu.pipeline_mode<synchronous>, transform_indices = @transform_3, window_bounds = array<i64: 1, 16>}, {transform_indices = @transform_4, window_bounds = array<i64: 8, 16>}]} {
    %c0 = arith.constant 0 : index
    %c0_0 = arith.constant 0 : index
    %0 = vector.load %arg1[%c0, %c0_0] : memref<8x32xf32, #tpu.memory_space<vmem>>, vector<8x32xf32>
    %1 = arith.mulf %0, %0 : vector<8x32xf32>
    %cst = arith.constant dense<0.000000e+00> : vector<8xf32>
    %2 = vector.multi_reduction <add>, %1, %cst [1] : vector<8x32xf32> to vector<8xf32>
    %3 = vector.shape_cast %2 : vector<8xf32> to vector<8x1xf32>
    %c0_1 = arith.constant 0 : index
    %c0_2 = arith.constant 0 : index
    %4 = vector.load %arg2[%c0_1, %c0_2] : memref<32x16xf32, #tpu.memory_space<vmem>>, vector<32x16xf32>
    %cst_3 = arith.constant dense<0.000000e+00> : vector<8x16xf32>
    %5 = tpu.matmul %0, %4, %cst_3 {dimension_numbers = #tpu.dot_dimension_numbers<[1], [0], [0], [1], [0, 0, 1, 1], [], []>, precision = #tpu.contract_precision<fp32>} : vector<8x32xf32>, vector<32x16xf32>, vector<8x16xf32> -> vector<8x16xf32>
    %c0_4 = arith.constant 0 : index
    %c0_5 = arith.constant 0 : index
    %6 = vector.load %arg3[%c0_4, %c0_5] : memref<1x16xf32, #tpu.memory_space<vmem>>, vector<1x16xf32>
    %7 = vector.broadcast %3 : vector<8x1xf32> to vector<8x16xf32>
    %8 = vector.broadcast %6 : vector<1x16xf32> to vector<8x16xf32>
    %9 = arith.addf %7, %8 : vector<8x16xf32>
    %cst_6 = arith.constant 2.000000e+00 : f32
    %10 = vector.broadcast %cst_6 : f32 to vector<8x16xf32>
    %11 = arith.mulf %10, %5 : vector<8x16xf32>
    %12 = arith.subf %9, %11 : vector<8x16xf32>
    %cst_7 = arith.constant 0.000000e+00 : f32
    %13 = vector.broadcast %cst_7 : f32 to vector<8x16xf32>
    %14 = arith.maximumf %12, %13 : vector<8x16xf32>
    %15 = math.sqrt %14 : vector<8x16xf32>
    %c0_8 = arith.constant 0 : index
    %c0_9 = arith.constant 0 : index
    %16 = vector.load %arg4[%c0_8, %c0_9] : memref<1x16xf32, #tpu.memory_space<vmem>>, vector<1x16xf32>
    %17 = vector.broadcast %16 : vector<1x16xf32> to vector<8x16xf32>
    %18 = arith.subf %15, %17 : vector<8x16xf32>
    %19 = math.tanh %18 : vector<8x16xf32>
    %c0_10 = arith.constant 0 : index
    %c0_11 = arith.constant 0 : index
    %20 = vector.load %arg5[%c0_10, %c0_11] : memref<8x16xf32, #tpu.memory_space<vmem>>, vector<8x16xf32>
    tpu.vector_store %arg5[%c0_10, %c0_11], %19 {strides = array<i32>} : memref<8x16xf32, #tpu.memory_space<vmem>>, vector<8x16xf32>,
    return
  }
  func.func @transform_0(%arg0: i32) -> (i32, i32) {
    %c0_i32 = arith.constant 0 : i32
    %c0_i32_0 = arith.constant 0 : i32
    return %arg0, %c0_i32 : i32, i32
  }
  func.func @transform_1(%arg0: i32) -> (i32, i32) {
    %c0_i32 = arith.constant 0 : i32
    %c0_i32_0 = arith.constant 0 : i32
    %c0_i32_1 = arith.constant 0 : i32
    return %c0_i32, %c0_i32_0 : i32, i32
  }
  func.func @transform_2(%arg0: i32) -> (i32, i32) {
    %c0_i32 = arith.constant 0 : i32
    %c0_i32_0 = arith.constant 0 : i32
    %c0_i32_1 = arith.constant 0 : i32
    return %c0_i32, %c0_i32_0 : i32, i32
  }
  func.func @transform_3(%arg0: i32) -> (i32, i32) {
    %c0_i32 = arith.constant 0 : i32
    %c0_i32_0 = arith.constant 0 : i32
    %c0_i32_1 = arith.constant 0 : i32
    return %c0_i32, %c0_i32_0 : i32, i32
  }
  func.func @transform_4(%arg0: i32) -> (i32, i32) {
    %c0_i32 = arith.constant 0 : i32
    %c0_i32_0 = arith.constant 0 : i32
    return %arg0, %c0_i32 : i32, i32
  }
}

</mosaic_0001>

<bundles_post_ra>
// kernel: tpu_custom_call.1
= control target key start
LH: loop header
LB: loop body
LE: loop exit
PB: predicated region body
PF: predicated region fallthrough
CT: control target
= control target key end

     0   :  { %v734_v3 = vmov 0.0|0.0   ;;  %vm20_vm0 = vcmask 261120   ;;  %vm735_vm1 = vmmov 0   ;;  %v736_v10 = vmov 0.0   ;;  %s820_s0 = inlined_call_operand.vmem [shape: f32[8,32], index: 0, kind: input, shape index: {}]   ;;  %s821_s1 = inlined_call_operand.vmem [shape: f32[32,16], index: 1, kind: input, shape index: {}]   ;;  %s822_s2 = inlined_call_operand.vmem [shape: f32[1,16], index: 2, kind: input, shape index: {}]   ;;  %s823_s3 = inlined_call_operand.vmem [shape: f32[1,16], index: 3, kind: input, shape index: {}]   ;;  %s824_s4 = inlined_call_operand.hbm [shape: f32[8,16], index: 4, kind: output, shape index: {}]  }
   0x1   :  { %v24_v0 = vld [vmem:[%s821_s1] sm:$0xff]  ;;  %v25_v1 = vld [vmem:[%s821_s1 + $0x8] sm:$0xff]  ;;  %v26_v2 = vld [vmem:[%s821_s1 + $0x10] sm:$0xff]  ;;  %657 = vmatprep.subr.bf16.mxu1 %v734_v3  ;;  %675 = vmatprep.subr.bf16.mxu0 %v734_v3 }
   0x2   :  { %v32_v4 = vand.u32 4294901760, %v24_v0  ;;  %v35_v5 = vand.u32 4294901760, %v25_v1  ;;  %v27_v6 = vld [vmem:[%s821_s1 + $0x18] sm:$0xff]  ;;  %v38_v7 = vand.u32 4294901760, %v26_v2  ;;  %v18_v8 = vld [vmem:[%s820_s0] sm:$0xff]  ;;  %599 = vmatprep.mubr.msk.f32.mxu1 %vm735_vm1, %v736_v10  ;;  %632 = vmatprep.mubr.msk.f32.mxu0 %vm735_vm1, %v736_v10 }
   0x3   :  { %v41_v9 = vand.u32 4294901760, %v27_v6  ;;  %v29_v11 = vsel %vm20_vm0, %v18_v8, 0  ;;  %v19_v12 = vmul.f32 %v18_v8, %v18_v8 }
   0x4   :  { %9 = vsyncpa [#allocation3], 0  ;;  %v658_v13 = vpack.c.bf16 %v35_v5, %v32_v4  ;;  %v112_v14 = vsub.f32 %v24_v0, %v32_v4  ;;  %v119_v15 = vsub.f32 %v25_v1, %v35_v5  ;;  %v126_v16 = vsub.f32 %v26_v2, %v38_v7  ;;  %v559_v45 = vld [vmem:[%s822_s2] ss:$0 sm:$0xff]  ;;  %s737_s2 = smov [#allocation2]  }
   0x5   :  { %v133_v17 = vsub.f32 %v27_v6, %v41_v9  ;;  %v100_v18 = vand.u32 4294901760, %v29_v11  ;;  %v21_v19 = vsel %vm20_vm0, %v19_v12, 0.0  ;;  %v661_v20 = vpack.c.bf16 %v41_v9, %v38_v7  ;;  %v560_v57 = vld [vmem:[%s823_s3] ss:$0 sm:$0xff]  ;;  %s551_s27 = sshll.u32 %s737_s2, 4  ;;  %s552_s27 = int_to_ptr.vmem [resolvable:$true] %s551_s27 }
   0x6   :  { %659 = vmatpush3.bf16.msra.mxu1 %v658_v13  ;;  %677 = vmatpush3.bf16.msra.mxu0 %v658_v13  ;;  %v113_v21 = vand.u32 4294901760, %v112_v14  ;;  %v120_v22 = vand.u32 4294901760, %v119_v15  ;;  %v127_v23 = vand.u32 4294901760, %v126_v16  ;;  %v670_v41 = vpack.c.bf16 %v119_v15, %v112_v14  ;;  %s710_s28 = scalar_lea.vmem %s552_s27, 128  ;;  %p715_p1 = scmp.lt.s32.totalorder %s552_s27, %s552_s27 }
   0x7   :  { %660 = vmatprep.subr.bf16.mxu1 %v734_v3  ;;  %678 = vmatprep.subr.bf16.mxu0 %v734_v3  ;;  %v101_v24 = vsub.f32 %v29_v11, %v100_v18  ;;  %v134_v25 = vand.u32 4294901760, %v133_v17  ;;  %v673_v42 = vpack.c.bf16 %v133_v17, %v126_v16  ;;  %vm543_vm4 = vcmask 130048   ;;  %p711_p0 = scmp.ne.s32.totalorder %s552_s27, %s710_s28  ;;  %p716_p2 = scmp.lt.s32.totalorder %s710_s28, %s710_s28 }
   0x8   :  { %v114_v26 = vsub.f32 %v112_v14, %v113_v21  ;;  %v121_v27 = vsub.f32 %v119_v15, %v120_v22  ;;  %v128_v28 = vsub.f32 %v126_v16, %v127_v23  ;;  %22 = vadd.xlane.f32.xlu0 %v21_v19  ;;  %v682_v33 = vpack.c.bf16 %v120_v22, %v113_v21 }
   0x9   :  { %v102_v29 = vand.u32 4294901760, %v101_v24  ;;  %v135_v30 = vsub.f32 %v133_v17, %v134_v25  ;;  %v685_v39 = vpack.c.bf16 %v134_v25, %v127_v23  ;;  %p717_p3 = por %p716_p2, %p715_p1 }
   0xa   :  { %662 = vmatpush3.bf16.msra.mxu1 %v661_v20  ;;  %680 = vmatpush3.bf16.msra.mxu0 %v661_v20  ;;  %v115_v31 = vand.u32 4294901760, %v114_v26  ;;  %v122_v32 = vand.u32 4294901760, %v121_v27  ;;  %v129_v36 = vand.u32 4294901760, %v128_v28 }
   0xb   :  { %v103_v34 = vsub.f32 %v101_v24, %v102_v29  ;;  %663 = vmatprep.subr.bf16.mxu1 %v734_v3  ;;  %681 = vmatprep.subr.bf16.mxu0 %v734_v3  ;;  %v136_v37 = vand.u32 4294901760, %v135_v30  ;;  %p718_p4 = pnand %p717_p3, %p711_p0 }
   0xc   :  { %v664_v35 = vpack.c.bf16 %v122_v32, %v115_v31 }
   0xd   :  { %v104_v38 = vand.u32 4294901760, %v103_v34  ;;  %633 = vmatmul.mubr.f32.vlgmr.msra.gmra.mrb[0].mxu0 %v102_v29  ;;  %v667_v40 = vpack.c.bf16 %v136_v37, %v129_v36 }
   0xe   :  { %683 = vmatpush3.bf16.msra.mxu0 %v682_v33  ;;  %643 = vmatprep.mubr.msk.f32.mxu0 %vm735_vm1, %v736_v10 }
   0xf   :  { %600 = vmatmul.mubr.f32.vlgmr.msra.gmra.mrb[0].mxu1 %v104_v38  ;;  %684 = vmatprep.subr.bf16.mxu0 %v734_v3 }
  0x10   :  { %665 = vmatpush3.bf16.msra.mxu1 %v664_v35  ;;  %610 = vmatprep.mubr.msk.f32.mxu1 %vm735_vm1, %v736_v10 }
  0x11   :  { %666 = vmatprep.subr.bf16.mxu1 %v734_v3 }
  0x12   :  { %686 = vmatpush3.bf16.msra.mxu0 %v685_v39 }
  0x13   :  { %687 = vmatprep.subr.bf16.mxu0 %v734_v3 }
  0x14   :  { %668 = vmatpush3.bf16.msra.mxu1 %v667_v40 }
  0x15   :  { %669 = vmatprep.subr.bf16.mxu1 %v734_v3  ;;  %644 = vmatmul.mubr.f32.vlgmr.msra.gmra.mrb[0].mxu0 %v100_v18 }
  0x16   :  { %689 = vmatpush3.bf16.msra.mxu0 %v658_v13  ;;  %654 = vmatprep.mubr.msk.f32.mxu0 %vm735_vm1, %v736_v10 }
  0x17   :  { %611 = vmatmul.mubr.f32.vlgmr.msra.gmra.mrb[0].mxu1 %v100_v18  ;;  %690 = vmatprep.subr.bf16.mxu0 %v734_v3 }
  0x18   :  { %671 = vmatpush3.bf16.msra.mxu1 %v670_v41  ;;  %621 = vmatprep.mubr.msk.f32.mxu1 %vm735_vm1, %v736_v10 }
  0x19   :  { %672 = vmatprep.subr.bf16.mxu1 %v734_v3 }
  0x1a   :  { %692 = vmatpush3.bf16.msra.mxu0 %v661_v20 }
  0x1c   :  { %674 = vmatpush3.bf16.msra.mxu1 %v673_v42 }
  0x1d   :  { %655 = vmatmul.mubr.f32.vlgmr.msra.gmra.mrb[0].mxu0 %v100_v18 }
  0x1f   :  { %622 = vmatmul.mubr.f32.vlgmr.msra.gmra.mrb[0].mxu1 %v101_v24 }
  0x95   :  { %v23_v44 = vpop.xlane.xlu0 %22 }
  0x96   :  { %v523_v50 = vadd.f32 %v559_v45, %v23_v44 }
  0xf0   :  { %v512_v43 = vpop.f32.mrb[0].mxu0 }
  0xf1   :  { %v656_v46 = vpop.f32.mrb[1].mxu0 }
  0xf2   :  { %v277_v47 = vpop.f32.mrb[0].mxu1 }
  0xf3   :  { %v693_v48 = vadd.f32 %v512_v43, %v277_v47  ;;  %v623_v49 = vpop.f32.mrb[1].mxu1 }
  0xf5   :  { %v524_v51 = vmul.f32 2.0, %v693_v48 }
  0xf7   :  { %v525_v52 = vsub.f32 %v523_v50, %v524_v51 }
  0xf9   :  { %v526_v53 = vmax.f32 %v525_v52, 0.0 }
  0xfb   :  { %706 = vrsqrt.f32 %v526_v53  ;;  %vm529_vm2 = vcmp.eq.f32.partialorder %v526_v53, inf  ;;  %v532_v56 = vand.u32 2147483648, %v526_v53  ;;  %vm531_vm3 = vcmp.eq.f32.partialorder %v526_v53, 0.0 }
 0x105   :  { %v707_v54 = vpop.eup %706 }
 0x106   :  { %v528_v55 = vmul.f32 %v707_v54, %v526_v53 }
 0x108   :  { %v530_v58 = vsel %vm529_vm2, %v526_v53, %v528_v55 }
 0x109   :  { %v533_v59 = vsel %vm531_vm3, %v532_v56, %v530_v58 }
 0x10a   :  { %v541_v60 = vsub.f32 %v533_v59, %v560_v57 }
 0x10c   :  { %708 = vtanh.f32 %v541_v60 }
 0x116   :  { %v709_v61 = vpop.eup %708 }
 0x117   :  { %544 = vst.msk [vmem:[#allocation2] sm:$0xff] %vm543_vm4, %v709_v61 }
 0x118   :  { %721 = shalt.err (!%p718_p4)
}
 0x119   :  { %s722_s30 = scalar_lea.hbm %s824_s4, 128 }
 0x11a   :  { %p723_p5 = scmp.ne.s32.totalorder %s824_s4, %s722_s30  ;;  %p726_p6 = scmp.lt.u32.totalorder %s722_s30, %s824_s4 }
 0x11c   :  { %p728_p7 = pnand %p726_p6, %p723_p5 }
 0x11e   :  { %731 = shalt.err (!%p728_p7)
}
 0x11f   :  { %554 = dma.vmem_to_hbm [thread:$0]  %s552_s27, 128, %s824_s4, [#allocation3]  }
 0x120   :  { %732 = dma.done.wait [#allocation3], 128  }
 0x121   :  { %733 = vsyncadd [#allocation3], 4294967168 }
 0x122   :  { %558 = vsyncpa [#allocation3], 1 }

</bundles_post_ra>
